<compile_context>
chip_gen: v6e
topology: v6e:2x2x1
jax: 0.10.0
libtpu: 0.0.40
codegen_flags: <defaults>
</compile_context>

<pallas_src>
import math
from functools import partial

import jax
import jax.numpy as jnp
from jax.experimental import pallas as pl
from jax.experimental.pallas import tpu as pltpu


def _pick_tile(dim, pref, align):
    """Largest multiple of `align` that divides `dim` and is <= pref.

    Falls back to the full dim when it is not `align`-aligned (full-extent
    blocks are always legal)."""
    if dim % align != 0 or dim <= align:
        return dim
    best = align
    t = align
    cap = min(dim, pref)
    while t <= cap:
        if dim % t == 0:
            best = t
        t += align
    return best


def _make_arc_kernel(scale):
    def arc_kernel(t_ref, cos_ref, tgt_ref, ctm_ref, ftl_ref, out_ref):
        # (tile_b, tile_c) elementwise hot path, all math in f32 vregs.
        ct = jnp.clip(cos_ref[...].astype(jnp.float32), -1.0, 1.0)
        t = t_ref[0, 0]                       # scalar EMA buffer (SMEM)
        ctm = ctm_ref[...]                    # (tile_b, 1) cos(theta + m)
        ftl = ftl_ref[...]                    # (tile_b, 1) final target logit

        # hard-example re-weighting: cos_theta[mask] = h * (t + h)
        out = jnp.where(ct > ctm, ct * (t + ct), ct)

        # scatter of the margin-adjusted target logit (one-hot compare against
        # the global column index of this class tile).
        tb, tc = ct.shape
        col = jax.lax.broadcasted_iota(jnp.int32, (tb, tc), 1) \
            + pl.program_id(1) * tc
        out = jnp.where(col == tgt_ref[...], ftl, out)

        out_ref[...] = (out * scale).astype(out_ref.dtype)

    return arc_kernel


@partial(jax.jit, static_argnames=("scale", "margin"))
def arc_softmax_forward(cos_theta, targets, t_old, *, scale, margin):
    """Returns (pred_class_logits, t_new) matching ArcSoftmax.forward.

    The stateful buffer `t` of the torch module is handled functionally:
    pass the old value, get the new value back.
    """
    B, C = cos_theta.shape
    cos_m = math.cos(margin)
    sin_m = math.sin(margin)
    threshold = math.cos(math.pi - margin)
    mm = math.sin(math.pi - margin) * margin

    tgt2d = targets.astype(jnp.int32).reshape(B, 1)

    # ---- (B,1)-sized glue: gather target logit, margin math, EMA update ----
    # XLA gather only touches B elements (vs. a full (B, C) read).
    tl = jnp.take_along_axis(cos_theta, tgt2d, axis=1).astype(jnp.float32)
    tl = jnp.clip(tl, -1.0, 1.0)                      # clamp BEFORE the sqrt
    sin_theta = jnp.sqrt(1.0 - tl * tl)
    cos_theta_m = tl * cos_m - sin_theta * sin_m      # (B, 1)
    final_tl = jnp.where(tl > threshold, cos_theta_m, tl - mm)

    # buffer update (torch.no_grad()): t = 0.01 * mean(target_logit) + 0.99 * t
    t_new = jnp.mean(tl) * 0.01 + (1.0 - 0.01) * t_old
    t_smem = t_new.reshape(1, 1).astype(jnp.float32)

    # ---- tile selection: lane-dense class tiles, bounded VMEM per block ----
    tile_c = _pick_tile(C, 1024, 128)      # multiple of 128, <= 1024
    tile_b = _pick_tile(B, 256, 8)         # multiple of 8,   <= 256
    grid = (B // tile_b, C // tile_c)

    out = pl.pallas_call(
        _make_arc_kernel(scale),
        out_shape=jax.ShapeDtypeStruct((B, C), cos_theta.dtype),
        grid=grid,
        in_specs=[
            pl.BlockSpec((1, 1), lambda bi, cj: (0, 0),
                         memory_space=pltpu.MemorySpace.SMEM),   # t (scalar)
            pl.BlockSpec((tile_b, tile_c), lambda bi, cj: (bi, cj)),  # cos
            pl.BlockSpec((tile_b, 1), lambda bi, cj: (bi, 0)),        # targets
            pl.BlockSpec((tile_b, 1), lambda bi, cj: (bi, 0)),        # cos_theta_m
            pl.BlockSpec((tile_b, 1), lambda bi, cj: (bi, 0)),        # final_tl
        ],
        out_specs=pl.BlockSpec((tile_b, tile_c), lambda bi, cj: (bi, cj)),
        compiler_params=pltpu.CompilerParams(
            dimension_semantics=("parallel", "parallel")),
    )(t_smem, cos_theta, tgt2d, cos_theta_m, final_tl)

    return out, t_new


def arc_softmax_reference(cos_theta, targets, t_old, *, scale, margin):
    cos_m, sin_m = math.cos(margin), math.sin(margin)
    threshold = math.cos(math.pi - margin)
    mm = math.sin(math.pi - margin) * margin
    ct = jnp.clip(cos_theta.astype(jnp.float32), -1.0, 1.0)
    tl = jnp.take_along_axis(ct, targets[:, None], axis=1)
    sin_theta = jnp.sqrt(1.0 - tl * tl)
    ctm = tl * cos_m - sin_theta * sin_m
    t_new = jnp.mean(tl) * 0.01 + (1.0 - 0.01) * t_old
    out = jnp.where(ct > ctm, ct * (t_new + ct), ct)
    final_tl = jnp.where(tl > threshold, ctm, tl - mm)
    onehot = jax.lax.broadcasted_iota(jnp.int32, ct.shape, 1) == targets[:, None]
    out = jnp.where(onehot, final_tl, out)
    return out * scale, t_new


if __name__ == "__main__":
    key = jax.random.PRNGKey(0)
    B, C = 16, 256
    scale, margin = 30.0, 0.5

    k1, k2 = jax.random.split(key)
    # cosine-similarity-like logits, slightly out of range to exercise the clamp
    cos_theta = jax.random.uniform(k1, (B, C), jnp.float32, -1.1, 1.1)
    targets = jax.random.randint(k2, (B,), 0, C, dtype=jnp.int32)
    t_buffer = jnp.zeros((), jnp.float32)   # register_buffer('t', zeros(1))

    pred, t_new = arc_softmax_forward(cos_theta, targets, t_buffer,
                                      scale=scale, margin=margin)
    pred = jax.block_until_ready(pred)

    ref, t_ref = arc_softmax_reference(cos_theta, targets, t_buffer,
                                       scale=scale, margin=margin)
    assert jnp.allclose(pred, ref, atol=1e-5, rtol=1e-5), "mismatch vs reference"
    assert jnp.allclose(t_new, t_ref, atol=1e-6), "t buffer mismatch"

    print("KERNEL_OK")
</pallas_src>

<mosaic_0001>
module attributes {stable_mosaic.version = 11 : i64} {
  func.func @arc_kernel(%arg0: i32, %arg1: i32, %arg2: memref<1x1xf32, #tpu.memory_space<smem>>, %arg3: memref<16x256xf32, #tpu.memory_space<vmem>>, %arg4: memref<16x1xi32, #tpu.memory_space<vmem>>, %arg5: memref<16x1xf32, #tpu.memory_space<vmem>>, %arg6: memref<16x1xf32, #tpu.memory_space<vmem>>, %arg7: memref<16x256xf32, #tpu.memory_space<vmem>>) attributes {dimension_semantics = [#tpu.dimension_semantics<parallel>, #tpu.dimension_semantics<parallel>], iteration_bounds = array<i64: 1, 1>, scalar_prefetch = 0 : i64, scratch_operands = 0 : i64, tpu.core_type = #tpu.core_type<tc>, window_params = [{transform_indices = @transform_0, window_bounds = array<i64: 1, 1>}, {transform_indices = @transform_1, window_bounds = array<i64: 16, 256>}, {transform_indices = @transform_2, window_bounds = array<i64: 16, 1>}, {transform_indices = @transform_3, window_bounds = array<i64: 16, 1>}, {transform_indices = @transform_4, window_bounds = array<i64: 16, 1>}, {transform_indices = @transform_5, window_bounds = array<i64: 16, 256>}]} {
    %c0 = arith.constant 0 : index
    %c0_0 = arith.constant 0 : index
    %0 = vector.load %arg3[%c0, %c0_0] : memref<16x256xf32, #tpu.memory_space<vmem>>, vector<16x256xf32>
    %cst = arith.constant -1.000000e+00 : f32
    %cst_1 = arith.constant 1.000000e+00 : f32
    %1 = vector.broadcast %cst : f32 to vector<16x256xf32>
    %2 = arith.maximumf %1, %0 : vector<16x256xf32>
    %3 = vector.broadcast %cst_1 : f32 to vector<16x256xf32>
    %4 = arith.minimumf %3, %2 : vector<16x256xf32>
    %c0_2 = arith.constant 0 : index
    %c0_3 = arith.constant 0 : index
    %5 = memref.load %arg2[%c0_2, %c0_3] : memref<1x1xf32, #tpu.memory_space<smem>>
    %c0_4 = arith.constant 0 : index
    %c0_5 = arith.constant 0 : index
    %6 = vector.load %arg5[%c0_4, %c0_5] : memref<16x1xf32, #tpu.memory_space<vmem>>, vector<16x1xf32>
    %c0_6 = arith.constant 0 : index
    %c0_7 = arith.constant 0 : index
    %7 = vector.load %arg6[%c0_6, %c0_7] : memref<16x1xf32, #tpu.memory_space<vmem>>, vector<16x1xf32>
    %8 = vector.broadcast %6 : vector<16x1xf32> to vector<16x256xf32>
    %9 = arith.cmpf ogt, %4, %8 : vector<16x256xf32>
    %10 = vector.broadcast %5 : f32 to vector<16x256xf32>
    %11 = arith.addf %10, %4 : vector<16x256xf32>
    %12 = arith.mulf %4, %11 : vector<16x256xf32>
    %13 = arith.select %9, %12, %4 : vector<16x256xi1>, vector<16x256xf32>
    %14 = tpu.iota {dimensions = array<i32: 1>} : vector<16x256xi32>
    %c256_i32 = arith.constant 256 : i32
    %15 = arith.muli %arg1, %c256_i32 : i32
    %16 = vector.broadcast %15 : i32 to vector<16x256xi32>
    %17 = arith.addi %14, %16 : vector<16x256xi32>
    %c0_8 = arith.constant 0 : index
    %c0_9 = arith.constant 0 : index
    %18 = vector.load %arg4[%c0_8, %c0_9] : memref<16x1xi32, #tpu.memory_space<vmem>>, vector<16x1xi32>
    %19 = vector.broadcast %18 : vector<16x1xi32> to vector<16x256xi32>
    %20 = arith.cmpi eq, %17, %19 : vector<16x256xi32>
    %21 = vector.shape_cast %7 : vector<16x1xf32> to vector<16x1xf32>
    %22 = vector.broadcast %21 : vector<16x1xf32> to vector<16x256xf32>
    %23 = arith.select %20, %22, %13 : vector<16x256xi1>, vector<16x256xf32>
    %cst_10 = arith.constant 3.000000e+01 : f32
    %24 = vector.broadcast %cst_10 : f32 to vector<16x256xf32>
    %25 = arith.mulf %23, %24 : vector<16x256xf32>
    %c0_11 = arith.constant 0 : index
    %c0_12 = arith.constant 0 : index
    %26 = vector.load %arg7[%c0_11, %c0_12] : memref<16x256xf32, #tpu.memory_space<vmem>>, vector<16x256xf32>
    tpu.vector_store %arg7[%c0_11, %c0_12], %25 {strides = array<i32>} : memref<16x256xf32, #tpu.memory_space<vmem>>, vector<16x256xf32>,
    return
  }
  func.func @transform_0(%arg0: i32, %arg1: i32) -> (i32, i32) {
    %c0_i32 = arith.constant 0 : i32
    %c0_i32_0 = arith.constant 0 : i32
    %c0_i32_1 = arith.constant 0 : i32
    return %c0_i32, %c0_i32_0 : i32, i32
  }
  func.func @transform_1(%arg0: i32, %arg1: i32) -> (i32, i32) {
    %c0_i32 = arith.constant 0 : i32
    return %arg0, %arg1 : i32, i32
  }
  func.func @transform_2(%arg0: i32, %arg1: i32) -> (i32, i32) {
    %c0_i32 = arith.constant 0 : i32
    %c0_i32_0 = arith.constant 0 : i32
    return %arg0, %c0_i32 : i32, i32
  }
  func.func @transform_3(%arg0: i32, %arg1: i32) -> (i32, i32) {
    %c0_i32 = arith.constant 0 : i32
    %c0_i32_0 = arith.constant 0 : i32
    return %arg0, %c0_i32 : i32, i32
  }
  func.func @transform_4(%arg0: i32, %arg1: i32) -> (i32, i32) {
    %c0_i32 = arith.constant 0 : i32
    %c0_i32_0 = arith.constant 0 : i32
    return %arg0, %c0_i32 : i32, i32
  }
  func.func @transform_5(%arg0: i32, %arg1: i32) -> (i32, i32) {
    %c0_i32 = arith.constant 0 : i32
    return %arg0, %arg1 : i32, i32
  }
}

</mosaic_0001>

<bundles_post_ra>
// kernel: arc_softmax_forward.1
= control target key start
LH: loop header
LB: loop body
LE: loop exit
PB: predicated region body
PF: predicated region fallthrough
CT: control target
= control target key end

     0   :  { %v155_v2 = vmov 0   ;;  %s225_s0 = inlined_call_operand.<no memory space> [shape: f32[1,1], index: 0, kind: input, shape index: {}]   ;;  %s226_s1 = inlined_call_operand.vmem [shape: f32[16,256], index: 1, kind: input, shape index: {}]   ;;  %s227_s2 = inlined_call_operand.vmem [shape: s32[16,1], index: 2, kind: input, shape index: {}]   ;;  %s228_s3 = inlined_call_operand.vmem [shape: f32[16,1], index: 3, kind: input, shape index: {}]   ;;  %s229_s4 = inlined_call_operand.vmem [shape: f32[16,1], index: 4, kind: input, shape index: {}]   ;;  %s230_s5 = inlined_call_operand.hbm [shape: f32[16,256], index: 5, kind: output, shape index: {}]  }
   0x1   :  { %v73_v0 = vld [vmem:[%s227_s2] sm:$0xff]  ;;  %132 = vset.pattern.permute.xlu1 %v155_v2  ;;  %131 = vset.pattern.permute.xlu0 %v155_v2  ;;  %v74_v3 = vld [vmem:[%s227_s2 + $0x8] sm:$0xff] }
   0x2   :  { %v35_v1 = vld [vmem:[%s228_s3] sm:$0xff]  ;;  %76 = vperm.xlu1 %132, %v73_v0   ;;  %v36_v4 = vld [vmem:[%s228_s3 + $0x8] sm:$0xff] }
   0x3   :  { %41 = vperm.xlu0 %131, %v35_v1  }
   0x4   :  { %11 = vsyncpa [#allocation4], 0  ;;  %v38_v5 = vld [vmem:[%s229_s4 + $0x8] sm:$0xff]  ;;  %v37_v6 = vld [vmem:[%s229_s4] sm:$0xff]  ;;  %v66_v11 = vlaneseq  ;;  %v53_v16 = vstv %s225_s0 }
   0x5   :  { %v22_v7 = vld [vmem:[%s226_s1] sm:$0xff]  ;;  %v23_v8 = vld [vmem:[%s226_s1 + $0x8] sm:$0xff]  ;;  %v24_v9 = vld [vmem:[%s226_s1 + $0x10] sm:$0xff] }
   0x6   :  { %79 = vperm.xlu1 %132, %v74_v3   ;;  %v25_v10 = vld [vmem:[%s226_s1 + $0x18] sm:$0xff]  ;;  %v123_v12 = vclamps-f32 %v22_v7, 1.0  ;;  %v124_v13 = vclamps-f32 %v23_v8, 1.0  ;;  %v125_v14 = vclamps-f32 %v24_v9, 1.0  ;;  %v67_v17 = vand.u32 127, %v66_v11  ;;  %s156_s1 = smov [#allocation3]  }
   0x7   :  { %46 = vperm.xlu0 %131, %v36_v4   ;;  %v126_v15 = vclamps-f32 %v25_v10, 1.0  ;;  %s112_s0 = sshll.u32 %s156_s1, 4  ;;  %s113_s0 = int_to_ptr.vmem [resolvable:$true] %s112_s0 }
   0x8   :  { %v54_v18 = vadd.f32 %v123_v12, %v53_v16  ;;  %v55_v19 = vadd.f32 %v124_v13, %v53_v16  ;;  %v56_v22 = vadd.f32 %v125_v14, %v53_v16  ;;  %v68_v24 = vadd.s32 128, %v67_v17  ;;  %s133_s12 = scalar_lea.vmem %s113_s0, 512  ;;  %p138_p1 = scmp.lt.s32.totalorder %s113_s0, %s113_s0 }
   0x9   :  { %v57_v23 = vadd.f32 %v126_v15, %v53_v16  ;;  %p134_p0 = scmp.ne.s32.totalorder %s113_s0, %s133_s12  ;;  %p139_p2 = scmp.lt.s32.totalorder %s133_s12, %s133_s12 }
   0xa   :  { %92 = vperm.xlu1 %132, %v38_v5   ;;  %v58_v25 = vmul.f32 %v123_v12, %v54_v18  ;;  %v59_v26 = vmul.f32 %v124_v13, %v55_v19  ;;  %v60_v29 = vmul.f32 %v125_v14, %v56_v22 }
   0xb   :  { %87 = vperm.xlu0 %131, %v37_v6   ;;  %v61_v30 = vmul.f32 %v126_v15, %v57_v23  ;;  %p140_p3 = por %p139_p2, %p138_p1 }
   0xd   :  { %p141_p4 = pnand %p140_p3, %p134_p0 }
  0x7d   :  { %v77_v20 = vpop.permute.xlu1 %76 }
  0x7e   :  { %v42_v21 = vpop.permute.xlu0 %41  ;;  %vm81_vm4 = vcmp.eq.s32.totalorder %v67_v17, %v77_v20  ;;  %vm82_vm5 = vcmp.eq.s32.totalorder %v68_v24, %v77_v20 }
  0x7f   :  { %vm49_vm0 = vcmp.gt.f32.partialorder %v123_v12, %v42_v21  ;;  %vm50_vm1 = vcmp.gt.f32.partialorder %v124_v13, %v42_v21 }
  0x80   :  { %v62_v31 = vsel %vm49_vm0, %v58_v25, %v123_v12  ;;  %v63_v32 = vsel %vm50_vm1, %v59_v26, %v124_v13 }
  0x81   :  { %v80_v27 = vpop.permute.xlu1 %79 }
  0x82   :  { %v47_v28 = vpop.permute.xlu0 %46  ;;  %vm83_vm6 = vcmp.eq.s32.totalorder %v67_v17, %v80_v27  ;;  %vm84_vm7 = vcmp.eq.s32.totalorder %v68_v24, %v80_v27 }
  0x83   :  { %vm51_vm2 = vcmp.gt.f32.partialorder %v125_v14, %v47_v28  ;;  %vm52_vm3 = vcmp.gt.f32.partialorder %v126_v15, %v47_v28 }
  0x84   :  { %v64_v34 = vsel %vm51_vm2, %v60_v29, %v125_v14  ;;  %v65_v35 = vsel %vm52_vm3, %v61_v30, %v126_v15 }
  0x85   :  { %v93_v33 = vpop.permute.xlu1 %92 }
  0x86   :  { %v88_v36 = vpop.permute.xlu0 %87  ;;  %v97_v37 = vsel %vm83_vm6, %v93_v33, %v64_v34  ;;  %v98_v38 = vsel %vm84_vm7, %v93_v33, %v65_v35 }
  0x87   :  { %v95_v39 = vsel %vm81_vm4, %v88_v36, %v62_v31  ;;  %v96_v40 = vsel %vm82_vm5, %v88_v36, %v63_v32  ;;  %v101_v41 = vmul.f32 30.0, %v97_v37  ;;  %v102_v42 = vmul.f32 30.0, %v98_v38 }
  0x88   :  { %v99_v43 = vmul.f32 30.0, %v95_v39  ;;  %v100_v44 = vmul.f32 30.0, %v96_v40 }
  0x89   :  { %105 = vst [vmem:[#allocation3 + $0x10] sm:$0xff] %v101_v41  ;;  %106 = vst [vmem:[#allocation3 + $0x18] sm:$0xff] %v102_v42 }
  0x8a   :  { %103 = vst [vmem:[#allocation3] sm:$0xff] %v99_v43  ;;  %104 = vst [vmem:[#allocation3 + $0x8] sm:$0xff] %v100_v44 }
  0x8b   :  { %144 = shalt.err (!%p141_p4)
}
  0x8c   :  { %s157_s13 = smov 256   ;;  %s158_s14 = smov 16  }
  0x8d   :  { %118 = dma.vmem_to_hbm [thread:$0]  %s113_s0, 512, %s230_s5, [#allocation4], %s157_s13, %s157_s13, %s158_s14  }
  0x8e   :  { %153 = dma.done.wait [#allocation4], 512  }
  0x8f   :  { %154 = vsyncadd [#allocation4], 4294966784 }
  0x90   :  { %122 = vsyncpa [#allocation4], 1 }

</bundles_post_ra>
